<compile_context>
chip_gen: v7x
topology: tpu7x:2x2x1
jax: 0.10.0
libtpu: 0.0.40
codegen_flags: <defaults>
</compile_context>

<pallas_src>
import functools

import jax
import jax.numpy as jnp
from jax.experimental import pallas as pl
from jax.experimental.pallas import tpu as pltpu


_LANES = 128
# ~4 MiB per f32 [C_pad, tile_n] intermediate.  With the double-buffered input
# (<= 2 x 4 MiB) and ~3-4 live f32 intermediates in the kernel this stays
# around 20-28 MiB, comfortably below the 48 MiB scoped limit requested below
# (and below v7x's 64 MiB physical VMEM; v5e/v6e have 128 MiB).
_TARGET_TILE_BYTES = 4 * 1024 * 1024
_VMEM_LIMIT_BYTES = 48 * 1024 * 1024
# Once there are at least this many batch columns, use >= 4 grid tiles so the
# "parallel" axis can shard across both v7x TensorCores.
_MIN_COLS_FOR_MULTI_TILE = 32 * 1024


def _round_up(x, m):
    return ((x + m - 1) // m) * m


def _cdiv(a, b):
    return -(-a // b)


def _choose_tiling(n, c_pad):
    """Pick (tile_n, num_tiles) for the batch/lane axis."""
    n128 = _round_up(max(n, 1), _LANES)
    bytes_per_col = c_pad * 4          # f32 intermediates dominate VMEM use
    max_cols = max(_LANES, (_TARGET_TILE_BYTES // bytes_per_col) // _LANES * _LANES)
    num = max(_cdiv(n128, max_cols), 1)
    if n128 >= _MIN_COLS_FOR_MULTI_TILE:
        num = max(num, 4)
    tile = _round_up(_cdiv(n128, num), _LANES)
    num = _cdiv(n128, tile)            # re-derive after rounding tile up
    return tile, num


def _focal_kernel(nvalid_ref, x_ref, w_ref, out_ref, *, gamma):
    """One tile.

    nvalid_ref: SMEM (1,) int32 -- true batch size N.
    x_ref:      [C_pad, T] logits tile (classes on sublanes, batch on lanes).
    w_ref:      [C_pad, 1] per-class weight; already carries the minus sign
                and (when averaging) the 1/(N*C) factor; 0 on padded classes.
    out_ref:    (8, 128) lane-dense block holding this tile's partial sum.
    """
    i = pl.program_id(0)
    x = x_ref[...].astype(jnp.float32)               # [Cp, T]
    w = w_ref[...].astype(jnp.float32)               # [Cp, 1]
    t = x.shape[-1]

    # Stable log-softmax over the class (sublane) axis -- cheap for small C.
    m = jnp.max(x, axis=0, keepdims=True)            # [1, T]
    z = x - m
    e = jnp.exp(z)                                   # [Cp, T]
    s = jnp.sum(e, axis=0, keepdims=True)            # [1, T]
    inv_s = pl.reciprocal(s, approx=True)            # EUP slot
    inv_s = inv_s * (2.0 - s * inv_s)                # one Newton step on [1,T]
    p = e * inv_s                                    # softmax (no [Cp,T] divide)
    log_p = z - jnp.log(s)                           # log-softmax

    omp = jnp.maximum(1.0 - p, 0.0)                  # clamp: no negative pow base
    if gamma == 2.0:                                 # default path: no pow
        focal = omp * omp
    else:
        focal = jnp.power(omp, gamma)

    # Padded classes have w == 0 -> contribute exactly 0.  w < 0 and
    # log_p <= 0, so per_elem >= 0.
    per_elem = w * focal * log_p                     # [Cp, T]
    col_loss = jnp.sum(per_elem, axis=0, keepdims=True)   # sublane reduce [1, T]

    # Mask batch-padding columns (global column index >= true N).  Padded
    # columns hold finite sentinel logits, so post-reduce masking is safe.
    col = jax.lax.broadcasted_iota(jnp.int32, (1, t), 1) + i * t
    valid = (col < nvalid_ref[0]).astype(jnp.float32)
    partial = jnp.sum(col_loss * valid)              # scalar partial for this tile

    # Lane-dense, unmasked store; wrapper reads one element per tile.
    out_ref[...] = jnp.full((8, _LANES), partial, dtype=jnp.float32)


def focal_loss_class_proportion(inputs, targets=None, class_propotion=None,
                                class_factor=None, gamma=2.0, alpha=0.8,
                                size_average=True, inputs_class_major=False):
    """inputs: [N, C] float (or [C, N] if inputs_class_major); targets: [N] int.

    Returns the scalar focal loss (mean over N*C if size_average else sum).
    """
    # TODO(synk): `targets` only feeds an unused class_mask scatter_ in the
    # PyTorch forward; it never reaches the loss, so it is ignored here.
    del targets

    if inputs_class_major:
        c, n = inputs.shape
    else:
        n, c = inputs.shape

    if class_propotion is None:
        class_propotion = jnp.ones((c,), jnp.float32)
    class_propotion = jnp.asarray(class_propotion, jnp.float32).reshape(-1)
    if class_factor is None:
        class_factor = jnp.ones((c,), jnp.float32)
    class_factor = jnp.asarray(class_factor, jnp.float32).reshape(-1)

    # Per-class weight computed once; fold in the minus sign and, when
    # averaging, the 1/(N*C) factor so the kernel skips the negate and the
    # wrapper skips the final divide.  (The PyTorch forward hard-codes 0.8.)
    scale = (1.0 / float(n * c)) if size_average else 1.0
    w = -(jnp.power(class_propotion, alpha) * class_factor) * scale   # [C]

    # bf16 packs 16 rows per sublane-tile; f32 packs 8.
    sublane = 16 if inputs.dtype == jnp.bfloat16 else 8
    c_pad = _round_up(c, sublane)
    tile_n, num_tiles = _choose_tiling(n, c_pad)
    n_pad = num_tiles * tile_n

    # Lane-dense layout: classes on sublanes, batch on lanes.  Padded class
    # rows get very negative logits (softmax weight ~0) and zero per-class
    # weight; padded batch columns are masked inside the kernel.  Under jit
    # the transpose + pad fuse into a single HBM copy.
    x_t = inputs if inputs_class_major else inputs.T                  # [C, N]
    x_t = jnp.pad(x_t, ((0, c_pad - c), (0, n_pad - n)),
                  constant_values=-1e9)
    w2d = jnp.pad(w.reshape(c, 1), ((0, c_pad - c), (0, 0)))          # [Cp, 1]
    n_arr = jnp.array([n], dtype=jnp.int32)                           # SMEM scalar

    kernel = functools.partial(_focal_kernel, gamma=float(gamma))

    grid_spec = pltpu.PrefetchScalarGridSpec(
        num_scalar_prefetch=1,
        grid=(num_tiles,),
        in_specs=[
            pl.BlockSpec((c_pad, tile_n), lambda i, n_ref: (0, i)),
            pl.BlockSpec((c_pad, 1), lambda i, n_ref: (0, 0)),
        ],
        out_specs=pl.BlockSpec((8, _LANES), lambda i, n_ref: (0, i)),
    )

    partials = pl.pallas_call(
        kernel,
        out_shape=jax.ShapeDtypeStruct((8, num_tiles * _LANES), jnp.float32),
        grid_spec=grid_spec,
        compiler_params=pltpu.CompilerParams(
            dimension_semantics=("parallel",),
            vmem_limit_bytes=_VMEM_LIMIT_BYTES),
    )(n_arr, x_t, w2d)

    # One partial per tile (each (8,128) output block is filled with its
    # tile's sum); scale/sign are already folded into w.
    return jnp.sum(partials[0, ::_LANES])


def _reference(inputs, class_propotion, class_factor, gamma=2.0, alpha=0.8,
               size_average=True):
    """Plain-JAX reference mirroring the PyTorch forward (per-class weights)."""
    probs = jax.nn.softmax(inputs, axis=1)
    log_p = jax.nn.log_softmax(inputs, axis=1)
    w = jnp.power(class_propotion, alpha) * class_factor
    batch_loss = -w[None, :] * jnp.power(1.0 - probs, gamma) * log_p
    return jnp.mean(batch_loss) if size_average else jnp.sum(batch_loss)


if __name__ == "__main__":
    key = jax.random.PRNGKey(0)
    k_logits, k_targets = jax.random.split(key)

    N, C = 16, 7   # matches the module's default class_factor length (7 classes)
    logits = jax.random.normal(k_logits, (N, C), dtype=jnp.float32) * 2.0
    targets = jax.random.randint(k_targets, (N,), 0, C, dtype=jnp.int32)

    class_propotion = jnp.array([1.0, 2.0, 0.5, 1.5, 1.0, 3.0, 0.25],
                                dtype=jnp.float32)
    class_factor = jnp.array([1.0, 1.0, 0.8, 1.2, 1.0, 0.9, 1.1],
                             dtype=jnp.float32)

    fn = jax.jit(functools.partial(focal_loss_class_proportion,
                                   gamma=2.0, alpha=0.8, size_average=True))
    loss = fn(logits, targets, class_propotion, class_factor)
    loss = jax.block_until_ready(loss)

    ref = _reference(logits, class_propotion, class_factor)
    assert jnp.isfinite(loss), "kernel produced non-finite loss"
    # Newton-refined reciprocal makes the kernel effectively f32-exact.
    assert jnp.allclose(loss, ref, rtol=1e-3, atol=1e-5), (loss, ref)

    print("KERNEL_OK")
</pallas_src>

<mosaic_0001>
module attributes {stable_mosaic.version = 11 : i64} {
  func.func @_focal_kernel(%arg0: i32, %arg1: memref<1xi32, #tpu.memory_space<smem>>, %arg2: memref<8x128xf32, #tpu.memory_space<vmem>>, %arg3: memref<8x1xf32, #tpu.memory_space<vmem>>, %arg4: memref<8x128xf32, #tpu.memory_space<vmem>>) attributes {dimension_semantics = [#tpu.dimension_semantics<parallel>], iteration_bounds = array<i64: 1>, scalar_prefetch = 1 : i64, scratch_operands = 0 : i64, tpu.core_type = #tpu.core_type<tc>, window_params = [{transform_indices = @transform_0, window_bounds = array<i64: 8, 128>}, {pipeline_mode = #tpu.pipeline_mode<synchronous>, transform_indices = @transform_1, window_bounds = array<i64: 8, 1>}, {transform_indices = @transform_2, window_bounds = array<i64: 8, 128>}]} {
    %c0 = arith.constant 0 : index
    %c0_0 = arith.constant 0 : index
    %0 = vector.load %arg2[%c0, %c0_0] : memref<8x128xf32, #tpu.memory_space<vmem>>, vector<8x128xf32>
    %c0_1 = arith.constant 0 : index
    %c0_2 = arith.constant 0 : index
    %1 = vector.load %arg3[%c0_1, %c0_2] : memref<8x1xf32, #tpu.memory_space<vmem>>, vector<8x1xf32>
    %cst = arith.constant dense<0xFF800000> : vector<128xf32>
    %2 = vector.multi_reduction <maximumf>, %0, %cst [0] : vector<8x128xf32> to vector<128xf32>
    %3 = vector.shape_cast %2 : vector<128xf32> to vector<1x128xf32>
    %4 = vector.broadcast %3 : vector<1x128xf32> to vector<8x128xf32>
    %5 = arith.subf %0, %4 : vector<8x128xf32>
    %6 = math.exp %5 : vector<8x128xf32>
    %cst_3 = arith.constant dense<0.000000e+00> : vector<128xf32>
    %7 = vector.multi_reduction <add>, %6, %cst_3 [0] : vector<8x128xf32> to vector<128xf32>
    %8 = vector.shape_cast %7 : vector<128xf32> to vector<1x128xf32>
    %9 = tpu.reciprocal %8 {approx = true} : vector<1x128xf32> -> vector<1x128xf32>
    %10 = arith.mulf %8, %9 : vector<1x128xf32>
    %cst_4 = arith.constant 2.000000e+00 : f32
    %11 = vector.broadcast %cst_4 : f32 to vector<1x128xf32>
    %12 = arith.subf %11, %10 : vector<1x128xf32>
    %13 = arith.mulf %9, %12 : vector<1x128xf32>
    %14 = vector.broadcast %13 : vector<1x128xf32> to vector<8x128xf32>
    %15 = arith.mulf %6, %14 : vector<8x128xf32>
    %16 = math.log %8 : vector<1x128xf32>
    %17 = vector.broadcast %16 : vector<1x128xf32> to vector<8x128xf32>
    %18 = arith.subf %5, %17 : vector<8x128xf32>
    %cst_5 = arith.constant 1.000000e+00 : f32
    %19 = vector.broadcast %cst_5 : f32 to vector<8x128xf32>
    %20 = arith.subf %19, %15 : vector<8x128xf32>
    %cst_6 = arith.constant 0.000000e+00 : f32
    %21 = vector.broadcast %cst_6 : f32 to vector<8x128xf32>
    %22 = arith.maximumf %20, %21 : vector<8x128xf32>
    %23 = arith.mulf %22, %22 : vector<8x128xf32>
    %24 = vector.broadcast %1 : vector<8x1xf32> to vector<8x128xf32>
    %25 = arith.mulf %24, %23 : vector<8x128xf32>
    %26 = arith.mulf %25, %18 : vector<8x128xf32>
    %cst_7 = arith.constant dense<0.000000e+00> : vector<128xf32>
    %27 = vector.multi_reduction <add>, %26, %cst_7 [0] : vector<8x128xf32> to vector<128xf32>
    %28 = vector.shape_cast %27 : vector<128xf32> to vector<1x128xf32>
    %29 = tpu.iota {dimensions = array<i32: 1>} : vector<1x128xi32>
    %c128_i32 = arith.constant 128 : i32
    %30 = arith.muli %arg0, %c128_i32 : i32
    %31 = vector.broadcast %30 : i32 to vector<1x128xi32>
    %32 = arith.addi %29, %31 : vector<1x128xi32>
    %c0_8 = arith.constant 0 : index
    %33 = memref.load %arg1[%c0_8] : memref<1xi32, #tpu.memory_space<smem>>
    %34 = vector.broadcast %33 : i32 to vector<1x128xi32>
    %35 = arith.cmpi slt, %32, %34 : vector<1x128xi32>
    %36 = arith.extui %35 : vector<1x128xi1> to vector<1x128xi32>
    %37 = arith.sitofp %36 : vector<1x128xi32> to vector<1x128xf32>
    %38 = arith.mulf %28, %37 : vector<1x128xf32>
    %39 = vector.shape_cast %38 : vector<1x128xf32> to vector<1x1x128xf32>
    %cst_9 = arith.constant dense<0.000000e+00> : vector<1xf32>
    %40 = vector.multi_reduction <add>, %39, %cst_9 [1, 2] : vector<1x1x128xf32> to vector<1xf32>
    %41 = vector.shape_cast %40 : vector<1xf32> to vector<1x1x1xf32>
    %42 = vector.extract %41[0, 0, 0] : f32 from vector<1x1x1xf32>
    %43 = vector.broadcast %42 : f32 to vector<8x128xf32>
    %c0_10 = arith.constant 0 : index
    %c0_11 = arith.constant 0 : index
    %44 = vector.load %arg4[%c0_10, %c0_11] : memref<8x128xf32, #tpu.memory_space<vmem>>, vector<8x128xf32>
    tpu.vector_store %arg4[%c0_10, %c0_11], %43 {strides = array<i32>} : memref<8x128xf32, #tpu.memory_space<vmem>>, vector<8x128xf32>,
    return
  }
  func.func @transform_0(%arg0: i32, %arg1: memref<1xi32, #tpu.memory_space<smem>>) -> (i32, i32) {
    %c0_i32 = arith.constant 0 : i32
    %c0_i32_0 = arith.constant 0 : i32
    return %c0_i32, %arg0 : i32, i32
  }
  func.func @transform_1(%arg0: i32, %arg1: memref<1xi32, #tpu.memory_space<smem>>) -> (i32, i32) {
    %c0_i32 = arith.constant 0 : i32
    %c0_i32_0 = arith.constant 0 : i32
    %c0_i32_1 = arith.constant 0 : i32
    return %c0_i32, %c0_i32_0 : i32, i32
  }
  func.func @transform_2(%arg0: i32, %arg1: memref<1xi32, #tpu.memory_space<smem>>) -> (i32, i32) {
    %c0_i32 = arith.constant 0 : i32
    %c0_i32_0 = arith.constant 0 : i32
    return %c0_i32, %arg0 : i32, i32
  }
}

</mosaic_0001>

<bundles_post_ra>
// kernel: focal_loss_class_proportion.1
= control target key start
LH: loop header
LB: loop body
LE: loop exit
PB: predicated region body
PF: predicated region fallthrough
CT: control target
= control target key end

     0   :  { %v94_v0 = vmov 0   ;;  %v54_v32 = vlaneseq  ;;  %v95_v40 = vmov 0.0   ;;  %vm65_vm1 = vcmask 1040384   ;;  %s128_s2 = inlined_call_operand.vmem [shape: f32[8,1], index: 2, kind: input, shape index: {}]   ;;  %s129_s1 = inlined_call_operand.vmem [shape: f32[8,128], index: 1, kind: input, shape index: {}]   ;;  %s130_s0 = inlined_call_operand.<no memory space> [shape: s32[1], index: 0, kind: input, shape index: {}]   ;;  %s131_s3 = inlined_call_operand.vmem [shape: f32[8,128], index: 3, kind: output, shape index: {}]  }
   0x1   :  { %87 = vset.pattern.permute.xlu0 %v94_v0  ;;  %v14_v1 = vld [vmem:[%s128_s2] sm:$0xff]  ;;  %v60_v36 = vstv %s130_s0 }
   0x2   :  { %43 = vperm.xlu0 %87, %v14_v1   ;;  %v13_v2 = vld [vmem:[%s129_s1] sm:$0xff]  ;;  %v55_v35 = vand.u32 127, %v54_v32 }
   0x3   :  { %v15_v3 = vrot.slane %v13_v2, 4 }
   0x4   :  { %vm61_vm0 = vcmp.lt.s32.totalorder %v55_v35, %v60_v36 }
   0x5   :  { %v16_v4 = vmax.f32 %v13_v2, %v15_v3  ;;  %v82_v41 = vsel %vm61_vm0, 1.0, %v95_v40 }
   0x7   :  { %v17_v5 = vrot.slane %v16_v4, 2 }
   0x9   :  { %v18_v6 = vmax.f32 %v16_v4, %v17_v5 }
   0xb   :  { %v19_v7 = vrot.slane %v18_v6, 1 }
   0xd   :  { %v20_v8 = vmax.f32 %v18_v6, %v19_v7 }
   0xf   :  { %v21_v9 = vsub.f32 %v13_v2, %v20_v8 }
  0x11   :  { %v22_v10 = vmul.f32 1.442695, %v21_v9 }
  0x13   :  { %88 = vpow2.f32 %v22_v10 }
  0x1d   :  { %v89_v11 = vpop.eup %88 }
  0x1e   :  { %v24_v12 = vrot.slane %v89_v11, 4 }
  0x20   :  { %v25_v13 = vadd.f32 %v89_v11, %v24_v12 }
  0x22   :  { %v26_v14 = vrot.slane %v25_v13, 2 }
  0x24   :  { %v27_v15 = vadd.f32 %v26_v14, %v25_v13 }
  0x26   :  { %v28_v16 = vrot.slane %v27_v15, 1 }
  0x28   :  { %v29_v17 = vadd.f32 %v28_v16, %v27_v15 }
  0x2a   :  { %90 = vrcp.f32 %v29_v17 }
  0x2b   :  { %92 = vlog2.f32 %v29_v17 }
  0x34   :  { %v91_v18 = vpop.eup %90 }
  0x35   :  { %v31_v19 = vmul.f32 %v91_v18, %v29_v17  ;;  %v93_v24 = vpop.eup %92 }
  0x36   :  { %v36_v26 = vmul.f32 0.6931472, %v93_v24 }
  0x37   :  { %v32_v20 = vsub.f32 2.0, %v31_v19 }
  0x38   :  { %v37_v28 = vsub.f32 %v21_v9, %v36_v26 }
  0x39   :  { %v33_v21 = vmul.f32 %v91_v18, %v32_v20 }
  0x3b   :  { %v34_v22 = vmul.f32 %v89_v11, %v33_v21 }
  0x3d   :  { %v38_v23 = vsub.f32 1.0, %v34_v22 }
  0x3f   :  { %v39_v25 = vmax.f32 %v38_v23, 0.0 }
  0x41   :  { %v40_v27 = vmul.f32 %v39_v25, %v39_v25 }
  0x81   :  { %v44_v29 = vpop.permute.xlu0 %43 }
  0x82   :  { %v46_v30 = vmul.f32 %v44_v29, %v40_v27 }
  0x84   :  { %v47_v31 = vmul.f32 %v46_v30, %v37_v28 }
  0x86   :  { %v48_v33 = vrot.slane %v47_v31, 4 }
  0x88   :  { %v49_v34 = vadd.f32 %v48_v33, %v47_v31 }
  0x8a   :  { %v50_v37 = vrot.slane %v49_v34, 2 }
  0x8c   :  { %v51_v38 = vadd.f32 %v50_v37, %v49_v34 }
  0x8e   :  { %v52_v39 = vrot.slane %v51_v38, 1 }
  0x90   :  { %v53_v42 = vadd.f32 %v52_v39, %v51_v38 }
  0x92   :  { %v64_v43 = vmul.f32 %v82_v41, %v53_v42 }
  0x94   :  { %v66_v44 = vsel %vm65_vm1, %v64_v43, 0.0 }
  0x95   :  { %67 = vadd.xlane.f32.xlu0 %v66_v44 }
 0x122   :  { %v68_v45 = vpop.xlane.xlu0 %67 }
 0x123   :  { %v69_v46 = vrot.slane %v68_v45, 4 }
 0x125   :  { %v70_v47 = vadd.f32 %v69_v46, %v68_v45 }
 0x127   :  { %v71_v48 = vrot.slane %v70_v47, 2 }
 0x129   :  { %v72_v49 = vadd.f32 %v71_v48, %v70_v47 }
 0x12b   :  { %v73_v50 = vrot.slane %v72_v49, 1 }
 0x12d   :  { %v74_v51 = vadd.f32 %v73_v50, %v72_v49 }
 0x12f   :  { %83 = vpush %v74_v51 }
 0x160   :  { %s84_s0 = spop %83 }
 0x161   :  { %v76_v52 = vstv %s84_s0 }
 0x162   :  { %77 = vst [vmem:[%s131_s3] sm:$0xff] %v76_v52 }

</bundles_post_ra>
